<compile_context>
chip_gen: v7x
topology: tpu7x:2x2x1
jax: 0.10.0
libtpu: 0.0.40
codegen_flags: <defaults>
</compile_context>

<pallas_src>
import math

import jax
import jax.numpy as jnp
from jax import lax
from jax.experimental import pallas as pl
from jax.experimental.pallas import tpu as pltpu

VOCAB = 32     # vocab_size
SEQ = 8        # per-word seq_len
DMODEL = 32    # model width
HIDDEN = 32    # classifier hidden width
S2 = 2 * SEQ   # stacked (word1 ; word2) rows
NEG_MASK = -1e9

# ---- lane-dense parameter slab layout: bf16 [ROWS, 128] -------------------
# rows  0..31 : lanes   0..31 wq*scale | 32..63 wk | 64..95 wv | 96..127 wo
# rows 32..63 : lanes   0..31 emb      | 32..95 w1 packed [w1a|w1b]
#               lanes 96..127: rows 32..47 pos (tiled x2)
#                              rows 48..63, lanes  96..111 mask bias [16,16]
#                              rows 48..49, lanes 112..127 pooling P [2,16]
# row  64     : lanes 0..31 b1
# row  65     : lanes 0..31 w2^T
# row  66     : lane 0      b2
ROWS = 80          # padded to a multiple of the bf16 (16,128) tile
R_QKVO = 0
R_BLK1 = 32
R_TAIL = 64


# ----------------------------- Pallas kernel ------------------------------ #
def _cognate_kernel(ids_ref, slab_ref, out_ref):
    """Fused forward of the batched (B=1) cognate model for one word pair.

    ids_ref : [2S, 1] int32   (word1 ids rows 0..S-1, word2 ids rows S..2S-1)
    slab_ref: [ROWS, 128] bf16 lane-dense packed parameters
    out_ref : [1, 1] float32  cognate logit
    """
    f32 = jnp.float32
    bf16 = jnp.bfloat16

    # --- parameter loads (all static slices of the single VMEM slab) -------
    wqkv = slab_ref[R_QKVO:R_QKVO + 32, 0:96]            # [32, 96] bf16
    wo = slab_ref[R_QKVO:R_QKVO + 32, 96:128]            # [32, 32] bf16
    emb = slab_ref[R_BLK1:R_BLK1 + 32, 0:32]             # [32, 32] bf16
    w1p = slab_ref[R_BLK1:R_BLK1 + 32, 32:96]            # [32, 64] bf16
    pos = slab_ref[R_BLK1:R_BLK1 + 16, 96:128].astype(f32)        # [16, 32]
    maskb = slab_ref[R_BLK1 + 16:R_BLK1 + 32, 96:112].astype(f32)  # [16, 16]
    poolm = slab_ref[R_BLK1 + 16:R_BLK1 + 18, 112:128]   # [2, 16] bf16
    b1 = slab_ref[R_TAIL + 0:R_TAIL + 1, 0:32].astype(f32)         # [1, 32]
    w2row = slab_ref[R_TAIL + 1:R_TAIL + 2, 0:32].astype(f32)      # [1, 32]
    b2 = slab_ref[R_TAIL + 2:R_TAIL + 3, 0:1].astype(f32)          # [1, 1]

    # --- embedding lookup as an exact one-hot matmul + learned positions ---
    ids = ids_ref[...]                                             # [2S, 1]
    vocab_iota = lax.broadcasted_iota(jnp.int32, (S2, VOCAB), 1)
    onehot = (vocab_iota == ids).astype(bf16)                      # [2S, V]
    x = jnp.dot(onehot, emb, preferred_element_type=f32) + pos     # [2S, D] f32
    xb = x.astype(bf16)

    # --- fused Q/K/V projection (one MXU op); scale pre-folded into wq -----
    qkv = jnp.dot(xb, wqkv, preferred_element_type=f32)            # [2S, 96]
    q = qkv[:, 0:32].astype(bf16)
    k = qkv[:, 32:64].astype(bf16)
    v = qkv[:, 64:96].astype(bf16)

    # --- single-head self-attention with baked-in block-diagonal mask ------
    s = lax.dot_general(q, k, (((1,), (1,)), ((), ())),
                        preferred_element_type=f32) + maskb        # [2S, 2S]
    s = s - jnp.max(s, axis=-1, keepdims=True)
    p = jnp.exp(s)
    p = p * pl.reciprocal(jnp.sum(p, axis=-1, keepdims=True), approx=True)
    a = jnp.dot(p.astype(bf16), v, preferred_element_type=f32)     # [2S, D]
    o = jnp.dot(a.astype(bf16), wo, preferred_element_type=f32) + x

    # --- per-word mean pooling as one matmul with the baked 1/8 P matrix ---
    pooled = jnp.dot(poolm, o.astype(bf16), preferred_element_type=f32)  # [2, D]

    # --- MLP head: lane-packed w1 -> one matmul, then slice-add ------------
    hc = jnp.dot(pooled.astype(bf16), w1p, preferred_element_type=f32)   # [2, 2H]
    h = hc[0:1, 0:HIDDEN] + hc[1:2, HIDDEN:2 * HIDDEN] + b1              # [1, H]
    h = jnp.maximum(h, 0.0)
    logit = jnp.sum(h * w2row, axis=-1, keepdims=True) + b2              # [1, 1]
    out_ref[...] = logit


def _cognate_forward_pallas(ids_2Sx1, param_slab):
    """ids_2Sx1: int32 [2S, 1] -> float32 [1, 1] logit (batched, B=1)."""
    vmem = pl.BlockSpec(memory_space=pltpu.MemorySpace.VMEM)
    return pl.pallas_call(
        _cognate_kernel,
        out_shape=jax.ShapeDtypeStruct((1, 1), jnp.float32),
        in_specs=[vmem, vmem],
        out_specs=vmem,
    )(ids_2Sx1, param_slab)


@jax.jit
def _pair_logit(param_slab, word1_b, word2_b):
    """Whole batched forward under one jit: [1,S],[1,S] ids -> [1] logit."""
    ids = jnp.concatenate([word1_b, word2_b], axis=1).astype(jnp.int32)
    ids = ids.reshape(S2, 1)
    return _cognate_forward_pallas(ids, param_slab).reshape(1)


# ------------------------- parameter construction -------------------------- #
def init_params(key):
    """Create f32 model parameters and the lane-dense bf16 kernel slab."""
    ks = jax.random.split(key, 8)
    s = 0.1
    params = {
        "emb": s * jax.random.normal(ks[0], (VOCAB, DMODEL), jnp.float32),
        "pos": s * jax.random.normal(ks[1], (SEQ, DMODEL), jnp.float32),
        "wq": s * jax.random.normal(ks[2], (DMODEL, DMODEL), jnp.float32),
        "wk": s * jax.random.normal(ks[3], (DMODEL, DMODEL), jnp.float32),
        "wv": s * jax.random.normal(ks[4], (DMODEL, DMODEL), jnp.float32),
        "wo": s * jax.random.normal(ks[5], (DMODEL, DMODEL), jnp.float32),
        "w1": s * jax.random.normal(ks[6], (2 * DMODEL, HIDDEN), jnp.float32),
        "b1": jnp.zeros((HIDDEN,), jnp.float32),
        "w2": s * jax.random.normal(ks[7], (HIDDEN, 1), jnp.float32),
        "b2": jnp.zeros((), jnp.float32),
    }
    return params, pack_slab(params)


def pack_slab(p):
    """Pack all parameters into one lane-dense bf16 [ROWS, 128] slab."""
    scale = 1.0 / math.sqrt(DMODEL)
    slab = jnp.zeros((ROWS, 128), jnp.float32)

    # fused [wq*scale | wk | wv | wo]
    slab = slab.at[R_QKVO:R_QKVO + 32, 0:32].set(p["wq"] * scale)
    slab = slab.at[R_QKVO:R_QKVO + 32, 32:64].set(p["wk"])
    slab = slab.at[R_QKVO:R_QKVO + 32, 64:96].set(p["wv"])
    slab = slab.at[R_QKVO:R_QKVO + 32, 96:128].set(p["wo"])

    # embedding | lane-packed classifier w1 [w1a | w1b]
    slab = slab.at[R_BLK1:R_BLK1 + 32, 0:32].set(p["emb"])
    slab = slab.at[R_BLK1:R_BLK1 + 32, 32:64].set(p["w1"][:DMODEL])
    slab = slab.at[R_BLK1:R_BLK1 + 32, 64:96].set(p["w1"][DMODEL:])

    # positions (pre-tiled for the stacked [2S, D] sequence)
    slab = slab.at[R_BLK1:R_BLK1 + 16, 96:128].set(jnp.tile(p["pos"], (2, 1)))

    # block-diagonal additive attention mask bias [2S, 2S]
    ri = jnp.arange(S2)[:, None]
    ci = jnp.arange(S2)[None, :]
    same_word = ((ri < SEQ) & (ci < SEQ)) | ((ri >= SEQ) & (ci >= SEQ))
    mask_bias = jnp.where(same_word, 0.0, NEG_MASK).astype(jnp.float32)
    slab = slab.at[R_BLK1 + 16:R_BLK1 + 32, 96:112].set(mask_bias)

    # block-diagonal 1/8 pooling matrix P [2, 2S]
    pool = jnp.zeros((2, S2), jnp.float32)
    pool = pool.at[0, 0:SEQ].set(1.0 / SEQ)
    pool = pool.at[1, SEQ:S2].set(1.0 / SEQ)
    slab = slab.at[R_BLK1 + 16:R_BLK1 + 18, 112:128].set(pool)

    # classifier tail
    slab = slab.at[R_TAIL + 0, 0:32].set(p["b1"])
    slab = slab.at[R_TAIL + 1, 0:32].set(p["w2"][:, 0])
    slab = slab.at[R_TAIL + 2, 0].set(p["b2"])
    return slab.astype(jnp.bfloat16)


# ------------------------ pure-JAX reference forward ----------------------- #
def _reference_forward(p, word1, word2):
    """f32 reference of the same model (weights bf16-rounded like the slab)."""
    bf = lambda a: a.astype(jnp.bfloat16).astype(jnp.float32)
    emb, pos = bf(p["emb"]), bf(p["pos"])
    wq, wk, wv, wo = bf(p["wq"]), bf(p["wk"]), bf(p["wv"]), bf(p["wo"])
    w1, b1, w2, b2 = bf(p["w1"]), bf(p["b1"]), bf(p["w2"]), bf(p["b2"])
    scale = 1.0 / math.sqrt(DMODEL)

    def encode(w):
        x = emb[w] + pos
        q, k, v = x @ wq, x @ wk, x @ wv
        s = (q @ k.T) * scale
        a = jax.nn.softmax(s, axis=-1) @ v
        o = a @ wo + x
        return o.mean(axis=0)

    h = jnp.concatenate([encode(word1), encode(word2)]) @ w1 + b1
    h = jnp.maximum(h, 0.0)
    return h @ w2[:, 0] + b2


# ------------------------- model + wrapper (glue) -------------------------- #
class TransformerCognateModel:
    """Batched model: (word1[B,S], word2[B,S]) int ids -> [B] float logits.

    Only B=1 is exercised (all the UnbatchedWrapper ever produces); the whole
    per-pair forward runs as one jitted dispatch around the fused Pallas kernel.
    """

    def __init__(self, param_slab):
        self.params = param_slab

    def __call__(self, word1, word2):
        assert word1.shape[0] == 1 and word2.shape[0] == 1
        return _pair_logit(self.params, word1, word2)    # [B] = [1]


class UnbatchedWrapper:
    """JAX port of the PyTorch UnbatchedWrapper: unsqueeze(0) every array
    argument, call the wrapped batched model, squeeze(0) every array output."""

    def __init__(self, model):
        self.__dict__["model"] = model

    def __call__(self, *args, **kwargs):
        b_args = [a[None] if isinstance(a, jnp.ndarray) else a for a in args]
        b_kwargs = {k: (v[None] if isinstance(v, jnp.ndarray) else v)
                    for k, v in kwargs.items()}
        out = self.model(*b_args, **b_kwargs)
        if isinstance(out, jnp.ndarray):
            return jnp.squeeze(out, axis=0)
        if isinstance(out, (tuple, list)):
            return type(out)(jnp.squeeze(o, axis=0)
                             if isinstance(o, jnp.ndarray) else o for o in out)
        return out

    def __getattr__(self, name):
        # Delegate attribute access to the wrapped model (mirrors PyTorch code).
        return getattr(self.__dict__["model"], name)


# ---------------------------------- main ----------------------------------- #
if __name__ == "__main__":
    key = jax.random.PRNGKey(0)
    pkey, k1, k2 = jax.random.split(key, 3)

    params, param_slab = init_params(pkey)
    batched_model = TransformerCognateModel(param_slab)
    unbatched_model = UnbatchedWrapper(batched_model)

    # Unbatched integer token sequences, shape [SEQ] (no batch dimension).
    word1 = jax.random.randint(k1, (SEQ,), 0, VOCAB, dtype=jnp.int32)
    word2 = jax.random.randint(k2, (SEQ,), 0, VOCAB, dtype=jnp.int32)

    out = unbatched_model(word1, word2)   # scalar logit, shape ()
    out = jax.block_until_ready(out)
    assert out.shape == () and out.dtype == jnp.float32

    # Loose-tolerance check vs a pure-JAX reference (bf16 weights + approx
    # reciprocal in the kernel => not bit-exact, but well within 1e-2).
    ref = _reference_forward(params, word1, word2)
    assert float(jnp.max(jnp.abs(out - ref))) < 1e-2, (float(out), float(ref))

    print("KERNEL_OK")
</pallas_src>

<mosaic_0001>
module attributes {stable_mosaic.version = 11 : i64} {
  func.func @_cognate_kernel(%arg0: memref<16x1xi32, #tpu.memory_space<vmem>>, %arg1: memref<80x128xbf16, #tpu.memory_space<vmem>>, %arg2: memref<1x1xf32, #tpu.memory_space<vmem>>) attributes {dimension_semantics = [], scalar_prefetch = 0 : i64, scratch_operands = 0 : i64, tpu.core_type = #tpu.core_type<tc>} {
    %c0 = arith.constant 0 : index
    %c0_0 = arith.constant 0 : index
    %0 = vector.load %arg1[%c0, %c0_0] : memref<80x128xbf16, #tpu.memory_space<vmem>>, vector<32x96xbf16>
    %c0_1 = arith.constant 0 : index
    %c96 = arith.constant 96 : index
    %1 = vector.load %arg1[%c0_1, %c96] : memref<80x128xbf16, #tpu.memory_space<vmem>>, vector<32x32xbf16>
    %c32 = arith.constant 32 : index
    %c0_2 = arith.constant 0 : index
    %2 = vector.load %arg1[%c32, %c0_2] : memref<80x128xbf16, #tpu.memory_space<vmem>>, vector<32x32xbf16>
    %c32_3 = arith.constant 32 : index
    %c32_4 = arith.constant 32 : index
    %3 = vector.load %arg1[%c32_3, %c32_4] : memref<80x128xbf16, #tpu.memory_space<vmem>>, vector<32x64xbf16>
    %c32_5 = arith.constant 32 : index
    %c96_6 = arith.constant 96 : index
    %4 = vector.load %arg1[%c32_5, %c96_6] : memref<80x128xbf16, #tpu.memory_space<vmem>>, vector<16x32xbf16>
    %5 = arith.extf %4 : vector<16x32xbf16> to vector<16x32xf32>
    %c48 = arith.constant 48 : index
    %c96_7 = arith.constant 96 : index
    %6 = vector.load %arg1[%c48, %c96_7] : memref<80x128xbf16, #tpu.memory_space<vmem>>, vector<16x16xbf16>
    %7 = arith.extf %6 : vector<16x16xbf16> to vector<16x16xf32>
    %c48_8 = arith.constant 48 : index
    %c112 = arith.constant 112 : index
    %8 = vector.load %arg1[%c48_8, %c112] : memref<80x128xbf16, #tpu.memory_space<vmem>>, vector<2x16xbf16>
    %c64 = arith.constant 64 : index
    %c0_9 = arith.constant 0 : index
    %9 = vector.load %arg1[%c64, %c0_9] : memref<80x128xbf16, #tpu.memory_space<vmem>>, vector<1x32xbf16>
    %10 = arith.extf %9 : vector<1x32xbf16> to vector<1x32xf32>
    %c65 = arith.constant 65 : index
    %c0_10 = arith.constant 0 : index
    %11 = vector.load %arg1[%c65, %c0_10] : memref<80x128xbf16, #tpu.memory_space<vmem>>, vector<1x32xbf16>
    %12 = arith.extf %11 : vector<1x32xbf16> to vector<1x32xf32>
    %c66 = arith.constant 66 : index
    %c0_11 = arith.constant 0 : index
    %13 = vector.load %arg1[%c66, %c0_11] : memref<80x128xbf16, #tpu.memory_space<vmem>>, vector<1x1xbf16>
    %14 = arith.extf %13 : vector<1x1xbf16> to vector<1x1xf32>
    %c0_12 = arith.constant 0 : index
    %c0_13 = arith.constant 0 : index
    %15 = vector.load %arg0[%c0_12, %c0_13] : memref<16x1xi32, #tpu.memory_space<vmem>>, vector<16x1xi32>
    %16 = tpu.iota {dimensions = array<i32: 1>} : vector<16x32xi32>
    %17 = vector.broadcast %15 : vector<16x1xi32> to vector<16x32xi32>
    %18 = arith.cmpi eq, %16, %17 : vector<16x32xi32>
    %19 = arith.extui %18 : vector<16x32xi1> to vector<16x32xi32>
    %20 = arith.sitofp %19 : vector<16x32xi32> to vector<16x32xf32>
    %21 = arith.truncf %20 : vector<16x32xf32> to vector<16x32xbf16>
    %cst = arith.constant dense<0.000000e+00> : vector<16x32xf32>
    %22 = tpu.matmul %21, %2, %cst {dimension_numbers = #tpu.dot_dimension_numbers<[1], [0], [0], [1], [0, 0, 1, 1], [], []>} : vector<16x32xbf16>, vector<32x32xbf16>, vector<16x32xf32> -> vector<16x32xf32>
    %23 = arith.addf %22, %5 : vector<16x32xf32>
    %24 = arith.truncf %23 : vector<16x32xf32> to vector<16x32xbf16>
    %cst_14 = arith.constant dense<0.000000e+00> : vector<16x96xf32>
    %25 = tpu.matmul %24, %0, %cst_14 {dimension_numbers = #tpu.dot_dimension_numbers<[1], [0], [0], [1], [0, 0, 1, 1], [], []>} : vector<16x32xbf16>, vector<32x96xbf16>, vector<16x96xf32> -> vector<16x96xf32>
    %26 = vector.extract_strided_slice %25 {offsets = [0, 0], sizes = [16, 32], strides = [1, 1]} : vector<16x96xf32> to vector<16x32xf32>
    %27 = arith.truncf %26 : vector<16x32xf32> to vector<16x32xbf16>
    %28 = vector.extract_strided_slice %25 {offsets = [0, 32], sizes = [16, 32], strides = [1, 1]} : vector<16x96xf32> to vector<16x32xf32>
    %29 = arith.truncf %28 : vector<16x32xf32> to vector<16x32xbf16>
    %30 = vector.extract_strided_slice %25 {offsets = [0, 64], sizes = [16, 32], strides = [1, 1]} : vector<16x96xf32> to vector<16x32xf32>
    %31 = arith.truncf %30 : vector<16x32xf32> to vector<16x32xbf16>
    %cst_15 = arith.constant dense<0.000000e+00> : vector<16x16xf32>
    %32 = tpu.matmul %27, %29, %cst_15 {dimension_numbers = #tpu.dot_dimension_numbers<[1], [1], [0], [0], [0, 0, 1, 0], [], []>} : vector<16x32xbf16>, vector<16x32xbf16>, vector<16x16xf32> -> vector<16x16xf32>
    %33 = arith.addf %32, %7 : vector<16x16xf32>
    %cst_16 = arith.constant dense<0xFF800000> : vector<16xf32>
    %34 = vector.multi_reduction <maximumf>, %33, %cst_16 [1] : vector<16x16xf32> to vector<16xf32>
    %35 = vector.shape_cast %34 : vector<16xf32> to vector<16x1xf32>
    %36 = vector.broadcast %35 : vector<16x1xf32> to vector<16x16xf32>
    %37 = arith.subf %33, %36 : vector<16x16xf32>
    %38 = math.exp %37 : vector<16x16xf32>
    %cst_17 = arith.constant dense<0.000000e+00> : vector<16xf32>
    %39 = vector.multi_reduction <add>, %38, %cst_17 [1] : vector<16x16xf32> to vector<16xf32>
    %40 = vector.shape_cast %39 : vector<16xf32> to vector<16x1xf32>
    %41 = tpu.reciprocal %40 {approx = true} : vector<16x1xf32> -> vector<16x1xf32>
    %42 = vector.broadcast %41 : vector<16x1xf32> to vector<16x16xf32>
    %43 = arith.mulf %38, %42 : vector<16x16xf32>
    %44 = arith.truncf %43 : vector<16x16xf32> to vector<16x16xbf16>
    %cst_18 = arith.constant dense<0.000000e+00> : vector<16x32xf32>
    %45 = tpu.matmul %44, %31, %cst_18 {dimension_numbers = #tpu.dot_dimension_numbers<[1], [0], [0], [1], [0, 0, 1, 1], [], []>} : vector<16x16xbf16>, vector<16x32xbf16>, vector<16x32xf32> -> vector<16x32xf32>
    %46 = arith.truncf %45 : vector<16x32xf32> to vector<16x32xbf16>
    %cst_19 = arith.constant dense<0.000000e+00> : vector<16x32xf32>
    %47 = tpu.matmul %46, %1, %cst_19 {dimension_numbers = #tpu.dot_dimension_numbers<[1], [0], [0], [1], [0, 0, 1, 1], [], []>} : vector<16x32xbf16>, vector<32x32xbf16>, vector<16x32xf32> -> vector<16x32xf32>
    %48 = arith.addf %47, %23 : vector<16x32xf32>
    %49 = arith.truncf %48 : vector<16x32xf32> to vector<16x32xbf16>
    %cst_20 = arith.constant dense<0.000000e+00> : vector<2x32xf32>
    %50 = tpu.matmul %8, %49, %cst_20 {dimension_numbers = #tpu.dot_dimension_numbers<[1], [0], [0], [1], [0, 0, 1, 1], [], []>} : vector<2x16xbf16>, vector<16x32xbf16>, vector<2x32xf32> -> vector<2x32xf32>
    %51 = arith.truncf %50 : vector<2x32xf32> to vector<2x32xbf16>
    %cst_21 = arith.constant dense<0.000000e+00> : vector<2x64xf32>
    %52 = tpu.matmul %51, %3, %cst_21 {dimension_numbers = #tpu.dot_dimension_numbers<[1], [0], [0], [1], [0, 0, 1, 1], [], []>} : vector<2x32xbf16>, vector<32x64xbf16>, vector<2x64xf32> -> vector<2x64xf32>
    %53 = vector.extract_strided_slice %52 {offsets = [0, 0], sizes = [1, 32], strides = [1, 1]} : vector<2x64xf32> to vector<1x32xf32>
    %54 = vector.extract_strided_slice %52 {offsets = [1, 32], sizes = [1, 32], strides = [1, 1]} : vector<2x64xf32> to vector<1x32xf32>
    %55 = arith.addf %53, %54 : vector<1x32xf32>
    %56 = arith.addf %55, %10 : vector<1x32xf32>
    %cst_22 = arith.constant 0.000000e+00 : f32
    %57 = vector.broadcast %cst_22 : f32 to vector<1x32xf32>
    %58 = arith.maximumf %56, %57 : vector<1x32xf32>
    %59 = arith.mulf %58, %12 : vector<1x32xf32>
    %cst_23 = arith.constant dense<0.000000e+00> : vector<1xf32>
    %60 = vector.multi_reduction <add>, %59, %cst_23 [1] : vector<1x32xf32> to vector<1xf32>
    %61 = vector.shape_cast %60 : vector<1xf32> to vector<1x1xf32>
    %62 = arith.addf %61, %14 : vector<1x1xf32>
    %c0_24 = arith.constant 0 : index
    %c0_25 = arith.constant 0 : index
    %63 = vector.load %arg2[%c0_24, %c0_25] : memref<1x1xf32, #tpu.memory_space<vmem>>, vector<1x1xf32>
    tpu.vector_store %arg2[%c0_24, %c0_25], %62 {strides = array<i32>} : memref<1x1xf32, #tpu.memory_space<vmem>>, vector<1x1xf32>,
    return
  }
}

</mosaic_0001>

<bundles_post_ra>
// kernel: _pair_logit.1
= control target key start
LH: loop header
LB: loop body
LE: loop exit
PB: predicated region body
PF: predicated region fallthrough
CT: control target
= control target key end

     0   :  { %7 = vsyncpa [#allocation3], 0  ;;  %s795_s0 = inlined_call_operand.vmem [shape: s32[16,1], index: 0, kind: input, shape index: {}]   ;;  %s796_s1 = inlined_call_operand.hbm [shape: bf16[80,128], index: 1, kind: input, shape index: {}]   ;;  %s797_s2 = inlined_call_operand.hbm [shape: f32[1,1], index: 2, kind: output, shape index: {}]  }
   0x1   :  { %8 = vsyncpa [#allocation4], 0  ;;  %s670_s9 = smov [#allocation2]   ;;  %s622_s13 = scalar_lea.hbm %s796_s1, 640 }
   0x2   :  { %s16_s10 = sshll.u32 %s670_s9, 4  ;;  %p623_p0 = scmp.ne.s32.totalorder %s796_s1, %s622_s13  ;;  %s17_s10 = int_to_ptr.vmem [resolvable:$true] %s16_s10 }
   0x3   :  { %p626_p1 = scmp.lt.u32.totalorder %s622_s13, %s796_s1 }
   0x5   :  { %p628_p2 = pnand %p626_p1, %p623_p0 }
   0x7   :  { %631 = shalt.err (!%p628_p2)
}
   0x8   :  { %s632_s18 = scalar_lea.vmem %s17_s10, 640  ;;  %p637_p4 = scmp.lt.s32.totalorder %s17_s10, %s17_s10 }
   0x9   :  { %p633_p3 = scmp.ne.s32.totalorder %s17_s10, %s632_s18  ;;  %p638_p5 = scmp.lt.s32.totalorder %s632_s18, %s632_s18 }
   0xb   :  { %p639_p6 = por %p638_p5, %p637_p4 }
   0xd   :  { %p640_p7 = pnand %p639_p6, %p633_p3 }
   0xf   :  { %643 = shalt.err (!%p640_p7)
}
  0x10   :  { %s671_s19 = smov 64   ;;  %s672_s20 = smov 4  }
  0x11   :  { %22 = dma.hbm_to_vmem [thread:$0]  %s796_s1, 640, %s17_s10, [#allocation3], %s671_s19, %s671_s19, %s672_s20  }
  0x12   :  { %666 = dma.done.wait [#allocation3], 640  }
  0x13   :  { %667 = vsyncadd [#allocation3], 4294966656  ;;  %v673_v0 = vmov 0   ;;  %v674_v1 = vmov 0.0   ;;  %v44_v2 = vld [vmem:[%s795_s0] sm:$0xff]  ;;  %v714_v3 = vld [vmem:[#allocation2 + $0x10] sm:$0xff]   ;;  %v46_v9 = vlaneseq }
  0x14   :  { %592 = vset.pattern.permute.xlu0 %v673_v0  ;;  %532 = vmatprep.subr.bf16.mxu0 %v674_v1  ;;  %v45_v4 = vld [vmem:[%s795_s0 + $0x8] sm:$0xff]  ;;  %v720_v5 = vld [vmem:[#allocation2 + $0x18] sm:$0xff]   ;;  %vm675_vm0 = vmmov 0   ;;  %v35_v6 = vunpack.c.l.bf16 %v714_v3  ;;  %v36_v7 = vunpack.c.h.bf16 %v714_v3  ;;  %s676_s0 = smov 32   ;;  %vm81_vm3 = vcmask 261120   ;;  %v605_v16 = vld [vmem:[#allocation2] sm:$0xff]  }
  0x15   :  { %540 = vmatprep.subr.bf16.mxu1 %v674_v1  ;;  %49 = vperm.xlu0 %592, %v44_v2   ;;  %v47_v10 = vand.u32 127, %v46_v9  ;;  %v606_v17 = vld [vmem:[#allocation2 + $0x8] sm:$0xff]   ;;  %v37_v27 = vunpack.c.l.bf16 %v720_v5  ;;  %v38_v28 = vunpack.c.h.bf16 %v720_v5  ;;  %s677_s1 = smov 96   ;;  %vm242_vm4 = vcmask 130048   ;;  %s678_s27 = smov 16  }
  0x16   :  { %533 = vmatpush3.bf16.msra.mxu0 %v714_v3  ;;  %536 = vmatprep.mubr.msk.bf16.mxu0 %vm675_vm0, %v674_v1  ;;  %v593_v8 = vpack.i.bf16 %v36_v7, %v35_v6  ;;  %v607_v2 = vld [vmem:[#allocation2 + $0x18] ss:$0 sps:$4 sm:$0x11]   ;;  %vm475_vm5 = vcmask 253952   ;;  %s679_s28 = smov [#allocation5]   ;;  %vm483_vm6 = vcmask 0  }
  0x17   :  { %534 = vmatprep.subr.bf16.mxu0 %v674_v1  ;;  %544 = vmatprep.mubr.msk.bf16.mxu1 %vm675_vm0, %v674_v1  ;;  %v598_v31 = vpack.i.bf16 %v38_v28, %v37_v27  ;;  %s491_s29 = sshll.u32 %s679_s28, 4  ;;  %s492_s29 = int_to_ptr.vmem [resolvable:$true] %s491_s29 }
  0x18   :  { %594 = vrot.lane.b32.xlu1 %v593_v8, %s676_s0  ;;  %541 = vmatpush3.bf16.msra.mxu1 %v605_v16  ;;  %s644_s30 = scalar_lea.vmem %s492_s29, 16  ;;  %s648_s3 = scalar_lea.vmem %s492_s29, 32 }
  0x19   :  { %52 = vperm.xlu0 %592, %v45_v4   ;;  %542 = vmatprep.subr.bf16.mxu1 %v674_v1  ;;  %p645_p8 = scmp.ne.s32.totalorder %s492_s29, %s644_s30  ;;  %p649_p9 = scmp.lt.s32.totalorder %s492_s29, %s492_s29 }
  0x1a   :  { %535 = vmatpush3.bf16.msra.mxu0 %v720_v5  ;;  %p650_p10 = scmp.lt.s32.totalorder %s648_s3, %s644_s30 }
  0x1b   :  { %548 = vmatprep.subr.bf16.mxu0 %v674_v1 }
  0x1c   :  { %543 = vmatpush3.bf16.msra.mxu1 %v606_v17  ;;  %p651_p11 = por %p650_p10, %p649_p9 }
  0x1d   :  { %554 = vmatprep.subr.bf16.mxu1 %v674_v1  ;;  %599 = vrot.lane.b32.xlu0 %v598_v31, %s676_s0 }
  0x1e   :  { %p652_p12 = pnand %p651_p11, %p645_p8 }
  0x8a   :  { %v595_v18 = vpop.permute.xlu1 %594 }
  0x94   :  { %v50_v11 = vpop.permute.xlu0 %49 }
  0x95   :  { %vm54_vm1 = vcmp.eq.s32.totalorder %v47_v10, %v50_v11 }
  0x96   :  { %v500_v13 = vsel %vm54_vm1, 1.0, %v674_v1 }
  0x98   :  { %v53_v12 = vpop.permute.xlu0 %52 }
  0x99   :  { %vm55_vm2 = vcmp.eq.s32.totalorder %v47_v10, %v53_v12 }
  0x9a   :  { %v501_v14 = vsel %vm55_vm2, 1.0, %v674_v1 }
  0x9b   :  { %v60_v15 = vpack.c.bf16 %v501_v14, %v500_v13 }
  0x9c   :  { %v600_v36 = vpop.permute.xlu0 %599 }
  0x9d   :  { %537 = vmatmul.mubr.msk.bf16.vlgmr.msra.gmra.mrb[0].mxu0 %vm81_vm3, %v60_v15 }
  0x9e   :  { %550 = vmatprep.mubr.msk.bf16.mxu0 %vm675_vm0, %v674_v1 }
 0x170   :  { %v119_v19 = vpop.f32.mrb[0].mxu0 }
 0x171   :  { %v538_v20 = vpop.f32.mrb[1].mxu0  ;;  %v739_v22 = vadd.low.f32.bf16 %v119_v19, %v595_v18 }
 0x172   :  { %v122_v21 = vpop.f32.mrb[2].mxu0 }
 0x173   :  { %v741_v23 = vadd.high.f32.bf16 %v122_v21, %v595_v18  ;;  %v539_v24 = vpop.f32.mrb[3].mxu0 }
 0x175   :  { %v126_v25 = vpack.c.bf16 %v741_v23, %v739_v22 }
 0x177   :  { %545 = vmatmul.mubr.msk.bf16.vlgmr.msra.gmra.mrb[0].mxu1 %vm81_vm3, %v126_v25 }
 0x178   :  { %556 = vmatprep.mubr.msk.bf16.mxu1 %vm675_vm0, %v674_v1 }
 0x24a   :  { %v176_v26 = vpop.f32.mrb[0].mxu1 }
 0x24b   :  { %v546_v29 = vpop.f32.mrb[1].mxu1 }
 0x24c   :  { %v179_v30 = vpop.f32.mrb[2].mxu1 }
 0x24d   :  { %v183_v32 = vpack.c.bf16 %v179_v30, %v176_v26  ;;  %v547_v33 = vpop.f32.mrb[3].mxu1 }
 0x24f   :  { %185 = vrot.lane.b32.xlu1 %v183_v32, %s677_s1 }
 0x2c1   :  { %v186_v34 = vpop.permute.xlu1 %185 }
 0x2c2   :  { %v199_v35 = vsel %vm81_vm3, %v186_v34, 0 }
 0x2c3   :  { %549 = vmatpush3.bf16.xpose.msra.mxu0 %v199_v35 }
 0x2c4   :  { %560 = vmatprep.subr.bf16.mxu0 %v674_v1 }
 0x2ca   :  { %551 = vmatmul.mubr.msk.bf16.vlgmr.msra.gmra.mrb[4].mxu0 %vm81_vm3, %v183_v32 }
 0x2cb   :  { %564 = vmatprep.mubr.msk.bf16.mxu0 %vm675_vm0, %v674_v1 }
 0x39d   :  { %v235_v37 = vpop.f32.mrb[4].mxu0 }
 0x39e   :  { %v620_v38 = vadd.low.f32.bf16 %v235_v37, %v600_v36  ;;  %v552_v39 = vpop.f32.mrb[5].mxu0 }
 0x39f   :  { %v238_v40 = vpop.f32.mrb[6].mxu0 }
 0x3a0   :  { %v621_v41 = vadd.high.f32.bf16 %v238_v40, %v600_v36  ;;  %v553_v42 = vpop.f32.mrb[7].mxu0  ;;  %v243_v43 = vsel %vm242_vm4, %v620_v38, -inf  ;;  %v42_v36 = vld [vmem:[#allocation2 + $0x20] sm:$0x2] }
 0x3a1   :  { %244 = vmax.xlane.f32.xlu1 %v243_v43  ;;  %v43_v37 = vunpack.c.l.bf16 %v42_v36 }
 0x3a2   :  { %v246_v44 = vsel %vm242_vm4, %v621_v41, -inf }
 0x3a3   :  { %247 = vmax.xlane.f32.xlu0 %v246_v44 }
 0x42e   :  { %v245_v45 = vpop.xlane.xlu1 %244 }
 0x42f   :  { %v249_v46 = vsub.f32 %v620_v38, %v245_v45  ;;  %v480_v38 = vrot.slane %v43_v37, 2 }
 0x430   :  { %v248_v47 = vpop.xlane.xlu0 %247 }
 0x431   :  { %v251_v48 = vmul.f32 1.442695, %v249_v46  ;;  %v250_v49 = vsub.f32 %v621_v41, %v248_v47 }
 0x433   :  { %610 = vpow2.f32 %v251_v48  ;;  %v253_v50 = vmul.f32 1.442695, %v250_v49 }
 0x435   :  { %612 = vpow2.f32 %v253_v50 }
 0x43d   :  { %v611_v51 = vpop.eup %610 }
 0x43e   :  { %v255_v52 = vsel %vm242_vm4, %v611_v51, 0.0 }
 0x43f   :  { %v613_v53 = vpop.eup %612  ;;  %256 = vadd.xlane.f32.xlu0 %v255_v52 }
 0x440   :  { %v258_v54 = vsel %vm242_vm4, %v613_v53, 0.0 }
 0x441   :  { %259 = vadd.xlane.f32.xlu1 %v258_v54 }
 0x452   :  { %314 = vrot.lane.b32.xlu1 %v605_v16, %s676_s0 }
 0x455   :  { %266 = vrot.lane.b32.xlu0 %v183_v32, %s671_s19 }
 0x456   :  { %316 = vrot.lane.b32.xlu1 %v606_v17, %s676_s0 }
 0x459   :  { %368 = vrot.lane.b32.xlu0 %v607_v2, %s678_s27 }
 0x45a   :  { %414 = vrot.lane.b32.xlu1 %v714_v3, %s677_s1 }
 0x45d   :  { %416 = vrot.lane.b32.xlu0 %v720_v5, %s677_s1 }
 0x4cc   :  { %v257_v55 = vpop.xlane.xlu0 %256 }
 0x4cd   :  { %614 = vrcp.f32 %v257_v55 }
 0x4ce   :  { %v260_v56 = vpop.xlane.xlu1 %259 }
 0x4cf   :  { %616 = vrcp.f32 %v260_v56 }
 0x4d0   :  { %v267_v57 = vpop.permute.xlu0 %266 }
 0x4d1   :  { %555 = vmatpush3.bf16.msra.mxu1 %v267_v57 }
 0x4d2   :  { %v315_v58 = vpop.permute.xlu1 %314  ;;  %568 = vmatprep.subr.bf16.mxu1 %v674_v1 }
 0x4d3   :  { %561 = vmatpush3.bf16.msra.mxu0 %v315_v58 }
 0x4d4   :  { %562 = vmatprep.subr.bf16.mxu0 %v674_v1  ;;  %v369_v9 = vpop.permute.xlu0 %368 }
 0x4d6   :  { %v317_v0 = vpop.permute.xlu1 %316 }
 0x4d7   :  { %v615_v59 = vpop.eup %614  ;;  %563 = vmatpush3.bf16.msra.mxu0 %v317_v0 }
 0x4d8   :  { %v263_v61 = vmul.f32 %v615_v59, %v611_v51  ;;  %574 = vmatprep.subr.bf16.mxu0 %v674_v1  ;;  %v417_v11 = vpop.permute.xlu0 %416 }
 0x4d9   :  { %v617_v60 = vpop.eup %616 }
 0x4da   :  { %v264_v62 = vmul.f32 %v617_v60, %v613_v53  ;;  %v415_v10 = vpop.permute.xlu1 %414 }
 0x4dc   :  { %v265_v63 = vpack.c.bf16 %v264_v62, %v263_v61 }
 0x4de   :  { %557 = vmatmul.mubr.msk.bf16.vlgmr.msra.gmra.mrb[4].mxu1 %vm242_vm4, %v265_v63 }
 0x4df   :  { %570 = vmatprep.mubr.msk.bf16.mxu1 %vm675_vm0, %v674_v1 }
 0x5b1   :  { %v306_v3 = vpop.f32.mrb[4].mxu1 }
 0x5b2   :  { %v558_v4 = vpop.f32.mrb[5].mxu1 }
 0x5b3   :  { %v309_v6 = vpop.f32.mrb[6].mxu1 }
 0x5b4   :  { %v313_v7 = vpack.c.bf16 %v309_v6, %v306_v3  ;;  %v559_v8 = vpop.f32.mrb[7].mxu1 }
 0x5b6   :  { %565 = vmatmul.mubr.msk.bf16.vlgmr.msra.gmra.mrb[8].mxu0 %vm81_vm3, %v313_v7 }
 0x5b7   :  { %578 = vmatprep.mubr.msk.bf16.mxu0 %vm675_vm0, %v674_v1  ;;  %575 = vmatpush3.bf16.msra.mxu0 %v415_v10 }
 0x5b8   :  { %576 = vmatprep.subr.bf16.mxu0 %v674_v1 }
 0x5bb   :  { %577 = vmatpush3.bf16.msra.mxu0 %v417_v11 }
 0x689   :  { %v357_v12 = vpop.f32.mrb[8].mxu0 }
 0x68a   :  { %v566_v13 = vpop.f32.mrb[9].mxu0  ;;  %v358_v14 = vadd.f32 %v739_v22, %v357_v12 }
 0x68b   :  { %v360_v5 = vpop.f32.mrb[10].mxu0 }
 0x68c   :  { %v361_v15 = vadd.f32 %v741_v23, %v360_v5  ;;  %v567_v16 = vpop.f32.mrb[11].mxu0  ;;  %v40_v23 = vld [vmem:[#allocation2 + $0x20] sm:$0x1] }
 0x68d   :  { %v41_v28 = vunpack.c.l.bf16 %v40_v23 }
 0x68e   :  { %v364_v17 = vpack.c.bf16 %v361_v15, %v358_v14 }
 0x68f   :  { %v472_v32 = vrot.slane %v41_v28, 1 }
 0x690   :  { %569 = vmatpush3.bf16.msra.mxu1 %v364_v17 }
 0x693   :  { %571 = vmatmul.mubr.msk.bf16.vlgmr.msra.gmra.mrb[8].mxu1 %vm242_vm4, %v369_v9 }
 0x766   :  { %v407_v18 = vpop.f32.mrb[8].mxu1 }
 0x767   :  { %v413_v19 = vpack.c.bf16 %v407_v18, %v407_v18  ;;  %v572_v20 = vpop.f32.mrb[9].mxu1 }
 0x768   :  { %v410_v21 = vpop.f32.mrb[10].mxu1 }
 0x769   :  { %579 = vmatmul.mubr.msk.bf16.vlgmr.msra.gmra.mrb[12].mxu0 %vm81_vm3, %v413_v19  ;;  %v573_v1 = vpop.f32.mrb[11].mxu1 }
 0x83c   :  { %v457_v24 = vpop.f32.mrb[12].mxu0 }
 0x83d   :  { %v464_v25 = vrot.slane %v457_v24, 1  ;;  %v580_v26 = vpop.f32.mrb[13].mxu0 }
 0x83e   :  { %v460_v27 = vpop.f32.mrb[14].mxu0 }
 0x83f   :  { %465 = vrot.lane.b32.xlu1 %v464_v25, %s677_s1  ;;  %v581_v22 = vpop.f32.mrb[15].mxu0 }
 0x8b1   :  { %v466_v29 = vpop.permute.xlu1 %465 }
 0x8b2   :  { %v468_v30 = vadd.f32 %v466_v29, %v457_v24 }
 0x8b4   :  { %v469_v31 = vadd.f32 %v468_v30, %v41_v28 }
 0x8b6   :  { %v470_v33 = vmax.f32 %v469_v31, 0.0 }
 0x8b8   :  { %v474_v34 = vmul.f32 %v472_v32, %v470_v33 }
 0x8ba   :  { %v476_v35 = vsel %vm475_vm5, %v474_v34, 0.0 }
 0x8bb   :  { %477 = vadd.xlane.f32.xlu0 %v476_v35 }
 0x948   :  { %v478_v39 = vpop.xlane.xlu0 %477 }
 0x949   :  { %v482_v40 = vadd.f32 %v480_v38, %v478_v39 }
 0x94b   :  { %484 = vst.msk [vmem:[#allocation5] sm:$0x1] %vm483_vm6, %v482_v40 }
 0x94c   :  { %655 = shalt.err (!%p652_p12)
}
 0x94d   :  { %s656_s6 = scalar_lea.hbm %s797_s2, 16 }
 0x94e   :  { %p657_p13 = scmp.ne.s32.totalorder %s797_s2, %s656_s6  ;;  %p660_p0 = scmp.lt.u32.totalorder %s656_s6, %s797_s2 }
 0x950   :  { %p662_p1 = pnand %p660_p0, %p657_p13 }
 0x952   :  { %665 = shalt.err (!%p662_p1)
}
 0x953   :  { %494 = dma.vmem_to_hbm [thread:$0]  %s492_s29, 16, %s797_s2, [#allocation4]  }
 0x954   :  { %668 = dma.done.wait [#allocation4], 16  }
 0x955   :  { %669 = vsyncadd [#allocation4], 4294967280 }
 0x956   :  { %498 = vsyncpa [#allocation3], 1 }
 0x957   :  { %499 = vsyncpa [#allocation4], 1 }

</bundles_post_ra>
